<compile_context>
chip_gen: v7x
topology: tpu7x:2x2x1
jax: 0.10.0
libtpu: 0.0.40
codegen_flags: <defaults>
</compile_context>

<pallas_src>
import functools
import math

import jax
import jax.numpy as jnp
import numpy as np
from jax.experimental import pallas as pl
from jax.experimental.pallas import tpu as pltpu

A_PAD = 64  # lanes reserved per logical row for the action one-hot (power of 2)


def _round_up(x, m):
    return (x + m - 1) // m * m


def _fwd_kernel(emb_ref, act_ref,
                w1_ref, b1_ref, w2_ref, b2_ref, w3_ref, b3_ref,
                o_ref, *, pack, a_pad):
    """Packed-row MLP: each VMEM row holds `pack` logical batch rows side by side.

    out = W3p @ ReLU(W2p @ ReLU(W1p @ [emb_packed, onehot_packed] + b1) + b2) + b3
    with Wkp the block-diagonal (pack-replicated) weights, f32 accumulation.
    """
    emb = emb_ref[...]                       # (TM, pack*din)  bf16
    act = act_ref[...]                       # (TM, pack)      int32
    tm = emb.shape[0]

    # In-register one-hot, already in packed layout: lanes [p*a_pad,(p+1)*a_pad)
    # hold one_hot(action of logical row pack*r + p).  Padded lanes (>= A) never
    # match a valid action and their weight rows are zero anyway.
    lane = jax.lax.broadcasted_iota(jnp.int32, (tm, pack * a_pad), 1)
    if pack == 1:
        sel = act[:, 0:1]
        lane_in = lane
    else:  # pack == 2
        sel = jnp.where(lane < a_pad, act[:, 0:1], act[:, 1:2])
        lane_in = jnp.bitwise_and(lane, a_pad - 1)          # a_pad is a power of two
    onehot = (lane_in == sel).astype(emb.dtype)             # (TM, pack*a_pad) bf16

    # Fused layer 1: single MXU pass, K = pack*(din + a_pad) (= 256 for din=64).
    x = jnp.concatenate([emb, onehot], axis=1)
    h = jnp.dot(x, w1_ref[...], preferred_element_type=jnp.float32)
    h = jnp.maximum(h + b1_ref[...], 0.0).astype(w2_ref.dtype)

    # Layer 2.
    h = jnp.dot(h, w2_ref[...], preferred_element_type=jnp.float32)
    h = jnp.maximum(h + b2_ref[...], 0.0).astype(w3_ref.dtype)

    # Output projection (no activation); single lane-dense 128-wide store.
    out = jnp.dot(h, w3_ref[...], preferred_element_type=jnp.float32) + b3_ref[...]
    o_ref[...] = out.astype(o_ref.dtype)


def forward_dynamics_rapid_forward(state_embedding, action, kernel_params):
    """Pallas forward.

    state_embedding: (B, input_size) float
    action:          (B,) or (B, 1) integer action indices
    returns:         (B, input_size) bfloat16 predicted next-state embedding
    """
    w1, b1, w2, b2, w3, b3 = kernel_params
    B, din = state_embedding.shape
    pack = w1.shape[0] // (din + A_PAD)          # 2 when din == 64, else 1
    hidden = w2.shape[0] // pack
    dout = w3.shape[1] // pack

    emb = state_embedding.astype(jnp.bfloat16)
    act = jnp.asarray(action).reshape(-1).astype(jnp.int32)   # matches .squeeze(0).long()

    # Pad batch so the packed layout keeps 8-row sublane alignment; padded rows
    # are dropped after the kernel (their garbage stays confined to themselves).
    bp = _round_up(max(B, 1), pack * 8)
    if bp != B:
        emb = jnp.pad(emb, ((0, bp - B), (0, 0)))
        act = jnp.pad(act, (0, bp - B))

    rows = bp // pack
    emb_p = emb.reshape(rows, pack * din)        # free reshape: same row-major bytes
    act_p = act.reshape(rows, pack)

    # Batch tile: up to 4096 logical rows per grid step, but at least 2 steps at
    # trainer batch sizes so v7x's two TensorCores both get work.  Per-block VMEM
    # stays ~1 MiB even at the cap, well inside every generation's scoped default.
    tm = min(4096 // pack, _round_up(pl.cdiv(rows, 2), 8))
    tm = max(tm, 8)
    grid = (pl.cdiv(rows, tm),)

    flops = 2 * bp * ((din + A_PAD) * hidden + hidden * hidden + hidden * dout)
    w_bytes = sum(int(p.size) * p.dtype.itemsize for p in kernel_params)
    bytes_accessed = bp * (din * 2 + dout * 2 + 4) + w_bytes

    out_p = pl.pallas_call(
        functools.partial(_fwd_kernel, pack=pack, a_pad=A_PAD),
        out_shape=jax.ShapeDtypeStruct((rows, pack * dout), jnp.bfloat16),
        grid=grid,
        in_specs=[
            pl.BlockSpec((tm, pack * din), lambda i: (i, 0)),   # packed embedding tile
            pl.BlockSpec((tm, pack), lambda i: (i, 0)),         # packed action indices
            pl.BlockSpec(w1.shape, lambda i: (0, 0)),           # resident weights/biases
            pl.BlockSpec(b1.shape, lambda i: (0, 0)),
            pl.BlockSpec(w2.shape, lambda i: (0, 0)),
            pl.BlockSpec(b2.shape, lambda i: (0, 0)),
            pl.BlockSpec(w3.shape, lambda i: (0, 0)),
            pl.BlockSpec(b3.shape, lambda i: (0, 0)),
        ],
        out_specs=pl.BlockSpec((tm, pack * dout), lambda i: (i, 0)),
        compiler_params=pltpu.CompilerParams(
            dimension_semantics=("parallel",)),
        cost_estimate=pl.CostEstimate(flops=int(flops), transcendentals=0,
                                      bytes_accessed=int(bytes_accessed)),
    )(emb_p, act_p, w1, b1, w2, b2, w3, b3)

    return out_p.reshape(bp, dout)[:B]


def _pack_params(ref_params, input_size, num_actions, hidden, pack):
    """Repack PyTorch-layout weights into packed/block-diagonal kernel weights."""
    (W1, b1), (W2, b2), (W3, b3) = ref_params
    din, dout = input_size, input_size
    W1e = W1[:, :din].T                          # (din, hidden)  embedding part of W1^T
    W1a = W1[:, din:].T                          # (A, hidden)    action part of W1^T

    w1 = jnp.zeros((pack * (din + A_PAD), pack * hidden), jnp.float32)
    w2 = jnp.zeros((pack * hidden, pack * hidden), jnp.float32)
    w3 = jnp.zeros((pack * hidden, pack * dout), jnp.float32)
    for p in range(pack):
        w1 = w1.at[p * din:(p + 1) * din, p * hidden:(p + 1) * hidden].set(W1e)
        base = pack * din + p * A_PAD
        w1 = w1.at[base:base + num_actions, p * hidden:(p + 1) * hidden].set(W1a)
        w2 = w2.at[p * hidden:(p + 1) * hidden, p * hidden:(p + 1) * hidden].set(W2.T)
        w3 = w3.at[p * hidden:(p + 1) * hidden, p * dout:(p + 1) * dout].set(W3.T)

    b1p = jnp.tile(b1, pack).reshape(1, pack * hidden).astype(jnp.float32)
    b2p = jnp.tile(b2, pack).reshape(1, pack * hidden).astype(jnp.float32)
    b3p = jnp.tile(b3, pack).reshape(1, pack * dout).astype(jnp.float32)
    return (w1.astype(jnp.bfloat16), b1p,
            w2.astype(jnp.bfloat16), b2p,
            w3.astype(jnp.bfloat16), b3p)


def init_params(key, input_size=64, num_actions=7, hidden=64):
    """Mirror the module init: orthogonal(gain=sqrt(2)) hidden layers, orthogonal(1) output, zero bias."""
    assert num_actions <= A_PAD, "kernel assumes num_actions <= 64"
    k1, k2, k3 = jax.random.split(key, 3)
    gain_relu = math.sqrt(2.0)  # nn.init.calculate_gain('relu')

    # PyTorch Linear weights are (out_features, in_features).
    W1 = jax.nn.initializers.orthogonal(scale=gain_relu)(
        k1, (hidden, input_size + num_actions), jnp.float32)
    W2 = jax.nn.initializers.orthogonal(scale=gain_relu)(
        k2, (hidden, hidden), jnp.float32)
    W3 = jax.nn.initializers.orthogonal(scale=1.0)(
        k3, (input_size, hidden), jnp.float32)
    b1 = jnp.zeros((hidden,), jnp.float32)
    b2 = jnp.zeros((hidden,), jnp.float32)
    b3 = jnp.zeros((input_size,), jnp.float32)

    ref_params = ((W1, b1), (W2, b2), (W3, b3))
    pack = 2 if input_size == 64 else 1          # 2 logical rows per 128-lane packed row
    kernel_params = _pack_params(ref_params, input_size, num_actions, hidden, pack)
    return kernel_params, ref_params


def _ref_forward(state_embedding, action, ref_params, num_actions):
    """Pure-JAX f32 reference matching the PyTorch module."""
    (W1, b1), (W2, b2), (W3, b3) = ref_params
    onehot = jax.nn.one_hot(action.reshape(-1).astype(jnp.int32),
                            num_actions, dtype=jnp.float32)
    x = jnp.concatenate([state_embedding, onehot], axis=1)
    h = jax.nn.relu(x @ W1.T + b1)
    h = jax.nn.relu(h @ W2.T + b2)
    return h @ W3.T + b3


if __name__ == "__main__":
    key = jax.random.PRNGKey(0)
    k_emb, k_act, k_par = jax.random.split(key, 3)

    input_size = 64     # output size of the RIDE/RAPID embedding network
    num_actions = 7     # minigrid action space
    B = 2

    state_embedding = jax.random.uniform(k_emb, (B, input_size), jnp.float32)
    action = jax.random.randint(k_act, (B, 1), 0, num_actions, jnp.int32)

    kernel_params, ref_params = init_params(k_par, input_size, num_actions)

    out = forward_dynamics_rapid_forward(state_embedding, action, kernel_params)
    out = jax.block_until_ready(out)
    assert out.shape == (B, input_size), out.shape

    ref = _ref_forward(state_embedding, action, ref_params, num_actions)
    # bf16 activation/weight I/O (f32 accumulation) => ~1e-2 relative deviation
    # from the f32 PyTorch reference is expected.
    np.testing.assert_allclose(np.asarray(out, dtype=np.float32), np.asarray(ref),
                               rtol=5e-2, atol=5e-2)

    print("KERNEL_OK")
</pallas_src>

<mosaic_0001>
module attributes {stable_mosaic.version = 11 : i64} {
  func.func @_fwd_kernel(%arg0: i32, %arg1: memref<8x128xbf16, #tpu.memory_space<vmem>>, %arg2: memref<8x2xi32, #tpu.memory_space<vmem>>, %arg3: memref<256x128xbf16, #tpu.memory_space<vmem>>, %arg4: memref<1x128xf32, #tpu.memory_space<vmem>>, %arg5: memref<128x128xbf16, #tpu.memory_space<vmem>>, %arg6: memref<1x128xf32, #tpu.memory_space<vmem>>, %arg7: memref<128x128xbf16, #tpu.memory_space<vmem>>, %arg8: memref<1x128xf32, #tpu.memory_space<vmem>>, %arg9: memref<8x128xbf16, #tpu.memory_space<vmem>>) attributes {dimension_semantics = [#tpu.dimension_semantics<parallel>], iteration_bounds = array<i64: 1>, scalar_prefetch = 0 : i64, scratch_operands = 0 : i64, tpu.core_type = #tpu.core_type<tc>, window_params = [{transform_indices = @transform_0, window_bounds = array<i64: 8, 128>}, {transform_indices = @transform_1, window_bounds = array<i64: 8, 2>}, {pipeline_mode = #tpu.pipeline_mode<synchronous>, transform_indices = @transform_2, window_bounds = array<i64: 256, 128>}, {pipeline_mode = #tpu.pipeline_mode<synchronous>, transform_indices = @transform_3, window_bounds = array<i64: 1, 128>}, {pipeline_mode = #tpu.pipeline_mode<synchronous>, transform_indices = @transform_4, window_bounds = array<i64: 128, 128>}, {pipeline_mode = #tpu.pipeline_mode<synchronous>, transform_indices = @transform_5, window_bounds = array<i64: 1, 128>}, {pipeline_mode = #tpu.pipeline_mode<synchronous>, transform_indices = @transform_6, window_bounds = array<i64: 128, 128>}, {pipeline_mode = #tpu.pipeline_mode<synchronous>, transform_indices = @transform_7, window_bounds = array<i64: 1, 128>}, {transform_indices = @transform_8, window_bounds = array<i64: 8, 128>}]} {
    %c0 = arith.constant 0 : index
    %c0_0 = arith.constant 0 : index
    %0 = vector.load %arg1[%c0, %c0_0] : memref<8x128xbf16, #tpu.memory_space<vmem>>, vector<8x128xbf16>
    %c0_1 = arith.constant 0 : index
    %c0_2 = arith.constant 0 : index
    %1 = vector.load %arg2[%c0_1, %c0_2] : memref<8x2xi32, #tpu.memory_space<vmem>>, vector<8x2xi32>
    %2 = tpu.iota {dimensions = array<i32: 1>} : vector<8x128xi32>
    %c64_i32 = arith.constant 64 : i32
    %3 = vector.broadcast %c64_i32 : i32 to vector<8x128xi32>
    %4 = arith.cmpi slt, %2, %3 : vector<8x128xi32>
    %5 = vector.extract_strided_slice %1 {offsets = [0, 0], sizes = [8, 1], strides = [1, 1]} : vector<8x2xi32> to vector<8x1xi32>
    %6 = vector.extract_strided_slice %1 {offsets = [0, 1], sizes = [8, 1], strides = [1, 1]} : vector<8x2xi32> to vector<8x1xi32>
    %7 = vector.shape_cast %5 : vector<8x1xi32> to vector<8x1xi32>
    %8 = vector.broadcast %7 : vector<8x1xi32> to vector<8x128xi32>
    %9 = vector.shape_cast %6 : vector<8x1xi32> to vector<8x1xi32>
    %10 = vector.broadcast %9 : vector<8x1xi32> to vector<8x128xi32>
    %11 = arith.select %4, %8, %10 : vector<8x128xi1>, vector<8x128xi32>
    %c63_i32 = arith.constant 63 : i32
    %12 = vector.broadcast %c63_i32 : i32 to vector<8x128xi32>
    %13 = arith.andi %2, %12 : vector<8x128xi32>
    %14 = arith.cmpi eq, %13, %11 : vector<8x128xi32>
    %15 = arith.extui %14 : vector<8x128xi1> to vector<8x128xi32>
    %16 = arith.sitofp %15 : vector<8x128xi32> to vector<8x128xf32>
    %17 = arith.truncf %16 : vector<8x128xf32> to vector<8x128xbf16>
    %18 = tpu.concatenate %0, %17 in 1 : vector<8x128xbf16>, vector<8x128xbf16> -> vector<8x256xbf16>
    %c0_3 = arith.constant 0 : index
    %c0_4 = arith.constant 0 : index
    %19 = vector.load %arg3[%c0_3, %c0_4] : memref<256x128xbf16, #tpu.memory_space<vmem>>, vector<256x128xbf16>
    %cst = arith.constant dense<0.000000e+00> : vector<8x128xf32>
    %20 = tpu.matmul %18, %19, %cst {dimension_numbers = #tpu.dot_dimension_numbers<[1], [0], [0], [1], [0, 0, 1, 1], [], []>} : vector<8x256xbf16>, vector<256x128xbf16>, vector<8x128xf32> -> vector<8x128xf32>
    %c0_5 = arith.constant 0 : index
    %c0_6 = arith.constant 0 : index
    %21 = vector.load %arg4[%c0_5, %c0_6] : memref<1x128xf32, #tpu.memory_space<vmem>>, vector<1x128xf32>
    %22 = vector.broadcast %21 : vector<1x128xf32> to vector<8x128xf32>
    %23 = arith.addf %20, %22 : vector<8x128xf32>
    %cst_7 = arith.constant 0.000000e+00 : f32
    %24 = vector.broadcast %cst_7 : f32 to vector<8x128xf32>
    %25 = arith.maximumf %23, %24 : vector<8x128xf32>
    %26 = arith.truncf %25 : vector<8x128xf32> to vector<8x128xbf16>
    %c0_8 = arith.constant 0 : index
    %c0_9 = arith.constant 0 : index
    %27 = vector.load %arg5[%c0_8, %c0_9] : memref<128x128xbf16, #tpu.memory_space<vmem>>, vector<128x128xbf16>
    %cst_10 = arith.constant dense<0.000000e+00> : vector<8x128xf32>
    %28 = tpu.matmul %26, %27, %cst_10 {dimension_numbers = #tpu.dot_dimension_numbers<[1], [0], [0], [1], [0, 0, 1, 1], [], []>} : vector<8x128xbf16>, vector<128x128xbf16>, vector<8x128xf32> -> vector<8x128xf32>
    %c0_11 = arith.constant 0 : index
    %c0_12 = arith.constant 0 : index
    %29 = vector.load %arg6[%c0_11, %c0_12] : memref<1x128xf32, #tpu.memory_space<vmem>>, vector<1x128xf32>
    %30 = vector.broadcast %29 : vector<1x128xf32> to vector<8x128xf32>
    %31 = arith.addf %28, %30 : vector<8x128xf32>
    %cst_13 = arith.constant 0.000000e+00 : f32
    %32 = vector.broadcast %cst_13 : f32 to vector<8x128xf32>
    %33 = arith.maximumf %31, %32 : vector<8x128xf32>
    %34 = arith.truncf %33 : vector<8x128xf32> to vector<8x128xbf16>
    %c0_14 = arith.constant 0 : index
    %c0_15 = arith.constant 0 : index
    %35 = vector.load %arg7[%c0_14, %c0_15] : memref<128x128xbf16, #tpu.memory_space<vmem>>, vector<128x128xbf16>
    %cst_16 = arith.constant dense<0.000000e+00> : vector<8x128xf32>
    %36 = tpu.matmul %34, %35, %cst_16 {dimension_numbers = #tpu.dot_dimension_numbers<[1], [0], [0], [1], [0, 0, 1, 1], [], []>} : vector<8x128xbf16>, vector<128x128xbf16>, vector<8x128xf32> -> vector<8x128xf32>
    %c0_17 = arith.constant 0 : index
    %c0_18 = arith.constant 0 : index
    %37 = vector.load %arg8[%c0_17, %c0_18] : memref<1x128xf32, #tpu.memory_space<vmem>>, vector<1x128xf32>
    %38 = vector.broadcast %37 : vector<1x128xf32> to vector<8x128xf32>
    %39 = arith.addf %36, %38 : vector<8x128xf32>
    %40 = arith.truncf %39 : vector<8x128xf32> to vector<8x128xbf16>
    %c0_19 = arith.constant 0 : index
    %c0_20 = arith.constant 0 : index
    %41 = vector.load %arg9[%c0_19, %c0_20] : memref<8x128xbf16, #tpu.memory_space<vmem>>, vector<8x128xbf16>
    tpu.vector_store %arg9[%c0_19, %c0_20], %40 {strides = array<i32>} : memref<8x128xbf16, #tpu.memory_space<vmem>>, vector<8x128xbf16>,
    return
  }
  func.func @transform_0(%arg0: i32) -> (i32, i32) {
    %c0_i32 = arith.constant 0 : i32
    %c0_i32_0 = arith.constant 0 : i32
    return %arg0, %c0_i32 : i32, i32
  }
  func.func @transform_1(%arg0: i32) -> (i32, i32) {
    %c0_i32 = arith.constant 0 : i32
    %c0_i32_0 = arith.constant 0 : i32
    return %arg0, %c0_i32 : i32, i32
  }
  func.func @transform_2(%arg0: i32) -> (i32, i32) {
    %c0_i32 = arith.constant 0 : i32
    %c0_i32_0 = arith.constant 0 : i32
    %c0_i32_1 = arith.constant 0 : i32
    return %c0_i32, %c0_i32_0 : i32, i32
  }
  func.func @transform_3(%arg0: i32) -> (i32, i32) {
    %c0_i32 = arith.constant 0 : i32
    %c0_i32_0 = arith.constant 0 : i32
    %c0_i32_1 = arith.constant 0 : i32
    return %c0_i32, %c0_i32_0 : i32, i32
  }
  func.func @transform_4(%arg0: i32) -> (i32, i32) {
    %c0_i32 = arith.constant 0 : i32
    %c0_i32_0 = arith.constant 0 : i32
    %c0_i32_1 = arith.constant 0 : i32
    return %c0_i32, %c0_i32_0 : i32, i32
  }
  func.func @transform_5(%arg0: i32) -> (i32, i32) {
    %c0_i32 = arith.constant 0 : i32
    %c0_i32_0 = arith.constant 0 : i32
    %c0_i32_1 = arith.constant 0 : i32
    return %c0_i32, %c0_i32_0 : i32, i32
  }
  func.func @transform_6(%arg0: i32) -> (i32, i32) {
    %c0_i32 = arith.constant 0 : i32
    %c0_i32_0 = arith.constant 0 : i32
    %c0_i32_1 = arith.constant 0 : i32
    return %c0_i32, %c0_i32_0 : i32, i32
  }
  func.func @transform_7(%arg0: i32) -> (i32, i32) {
    %c0_i32 = arith.constant 0 : i32
    %c0_i32_0 = arith.constant 0 : i32
    %c0_i32_1 = arith.constant 0 : i32
    return %c0_i32, %c0_i32_0 : i32, i32
  }
  func.func @transform_8(%arg0: i32) -> (i32, i32) {
    %c0_i32 = arith.constant 0 : i32
    %c0_i32_0 = arith.constant 0 : i32
    return %arg0, %c0_i32 : i32, i32
  }
}

</mosaic_0001>

<bundles_post_ra>
// kernel: tpu_custom_call.1
= control target key start
LH: loop header
LB: loop body
LE: loop exit
PB: predicated region body
PF: predicated region fallthrough
CT: control target
= control target key end

     0   :  { %13 = vsyncpa [#allocation3], 0  ;;  %s918_s0 = inlined_call_operand.vmem [shape: bf16[8,128], index: 0, kind: input, shape index: {}]   ;;  %s919_s1 = inlined_call_operand.vmem [shape: s32[8,2], index: 1, kind: input, shape index: {}]   ;;  %s920_s2 = inlined_call_operand.hbm [shape: bf16[256,128], index: 2, kind: input, shape index: {}]   ;;  %s921_s3 = inlined_call_operand.vmem [shape: f32[1,128], index: 3, kind: input, shape index: {}]   ;;  %s922_s4 = inlined_call_operand.hbm [shape: bf16[128,128], index: 4, kind: input, shape index: {}]   ;;  %s923_s5 = inlined_call_operand.vmem [shape: f32[1,128], index: 5, kind: input, shape index: {}]   ;;  %s924_s6 = inlined_call_operand.hbm [shape: bf16[128,128], index: 6, kind: input, shape index: {}]   ;;  %s925_s7 = inlined_call_operand.vmem [shape: f32[1,128], index: 7, kind: input, shape index: {}]   ;;  %s926_s8 = inlined_call_operand.hbm [shape: bf16[8,128], index: 8, kind: output, shape index: {}]  }
   0x1   :  { %14 = vsyncpa [#allocation6], 0 }
   0x2   :  { %15 = vsyncpa [#allocation4], 0  ;;  %s765_s27 = smov [#allocation5]   ;;  %s766_s29 = smov [#allocation2]  }
   0x3   :  { %s39_s28 = sshll.u32 %s765_s27, 4  ;;  %s25_s30 = sshll.u32 %s766_s29, 4  ;;  %s40_s28 = int_to_ptr.vmem [resolvable:$true] %s39_s28  ;;  %s821_s30 = int_to_ptr.vmem [resolvable:$true] %s25_s30 }
   0x4   :  { %s671_s11 = scalar_lea.hbm %s922_s4, 1024 }
   0x5   :  { %p672_p0 = scmp.ne.s32.totalorder %s922_s4, %s671_s11  ;;  %p675_p1 = scmp.lt.u32.totalorder %s671_s11, %s922_s4 }
   0x7   :  { %p677_p2 = pnand %p675_p1, %p672_p0 }
   0x9   :  { %680 = shalt.err (!%p677_p2)
}
   0xa   :  { %s681_s16 = scalar_lea.vmem %s40_s28, 1024  ;;  %p686_p4 = scmp.lt.s32.totalorder %s40_s28, %s40_s28 }
   0xb   :  { %p682_p3 = scmp.ne.s32.totalorder %s40_s28, %s681_s16  ;;  %p687_p5 = scmp.lt.s32.totalorder %s681_s16, %s681_s16 }
   0xd   :  { %p688_p6 = por %p687_p5, %p686_p4 }
   0xf   :  { %p689_p7 = pnand %p688_p6, %p682_p3 }
  0x11   :  { %692 = shalt.err (!%p689_p7)
}
  0x12   :  { %s767_s17 = smov 64   ;;  %s768_s18 = smov 4  }
  0x13   :  { %45 = dma.hbm_to_vmem [thread:$0]  %s922_s4, 1024, %s40_s28, [#allocation6], %s767_s17, %s767_s17, %s768_s18  }
  0x14   :  { %s693_s23 = scalar_lea.hbm %s920_s2, 2048 }
  0x15   :  { %p694_p8 = scmp.ne.s32.totalorder %s920_s2, %s693_s23  ;;  %p697_p9 = scmp.lt.u32.totalorder %s693_s23, %s920_s2 }
  0x17   :  { %p699_p10 = pnand %p697_p9, %p694_p8 }
  0x19   :  { %702 = shalt.err (!%p699_p10)
}
  0x1a   :  { %s703_s29 = scalar_lea.vmem %s821_s30, 2048  ;;  %p708_p12 = scmp.lt.s32.totalorder %s821_s30, %s821_s30 }
  0x1b   :  { %p704_p11 = scmp.ne.s32.totalorder %s821_s30, %s703_s29  ;;  %p709_p13 = scmp.lt.s32.totalorder %s703_s29, %s703_s29 }
  0x1d   :  { %p710_p0 = por %p709_p13, %p708_p12 }
  0x1f   :  { %p711_p1 = pnand %p710_p0, %p704_p11 }
  0x21   :  { %714 = shalt.err (!%p711_p1)
}
  0x22   :  { %31 = dma.hbm_to_vmem [thread:$0]  %s920_s2, 2048, %s821_s30, [#allocation3], %s767_s17, %s767_s17, %s768_s18  }
  0x23   :  { %s769_s9 = smov [#allocation7]   ;;  %s715_s13 = scalar_lea.hbm %s924_s6, 1024 }
  0x24   :  { %s53_s10 = sshll.u32 %s769_s9, 4  ;;  %p716_p2 = scmp.ne.s32.totalorder %s924_s6, %s715_s13  ;;  %s54_s10 = int_to_ptr.vmem [resolvable:$true] %s53_s10 }
  0x25   :  { %p719_p3 = scmp.lt.u32.totalorder %s715_s13, %s924_s6 }
  0x27   :  { %p721_p4 = pnand %p719_p3, %p716_p2 }
  0x29   :  { %724 = shalt.err (!%p721_p4)
}
  0x2a   :  { %s725_s20 = scalar_lea.vmem %s54_s10, 1024  ;;  %p730_p6 = scmp.lt.s32.totalorder %s54_s10, %s54_s10 }
  0x2b   :  { %p726_p5 = scmp.ne.s32.totalorder %s54_s10, %s725_s20  ;;  %p731_p7 = scmp.lt.s32.totalorder %s725_s20, %s725_s20 }
  0x2d   :  { %p732_p8 = por %p731_p7, %p730_p6 }
  0x2f   :  { %p733_p9 = pnand %p732_p8, %p726_p5 }
  0x31   :  { %736 = shalt.err (!%p733_p9)
}
  0x32   :  { %59 = dma.hbm_to_vmem [thread:$0]  %s924_s6, 1024, %s54_s10, [#allocation6], %s767_s17, %s767_s17, %s768_s18  }
  0x33   :  { %759 = dma.done.wait [#allocation3], 2048  }
  0x34   :  { %760 = vsyncadd [#allocation3], 4294965248 }
  0x35   :  { %761 = dma.done.wait [#allocation6], 2048  }
  0x36   :  { %762 = vsyncadd [#allocation6], 4294965248  ;;  %v770_v0 = vmov 0   ;;  %v73_v1 = vld [vmem:[%s919_s1] sm:$0xff]  ;;  %v641_v4 = vld [vmem:[#allocation2 + $0x48] sm:$0xff]   ;;  %v771_v6 = vmov 1   ;;  %v74_v26 = vlaneseq }
  0x37   :  { %637 = vset.pattern.permute.xlu0 %v770_v0  ;;  %v639_v2 = vld [vmem:[#allocation2 + $0x40] sm:$0xff]   ;;  %v642_v5 = vld [vmem:[#allocation2 + $0x8] sm:$0xff]   ;;  %v643_v7 = vld [vmem:[#allocation2 + $0x50] sm:$0xff]   ;;  %v772_v10 = vmov 0.0   ;;  %v773_v33 = vmov 1.0|1.0  }
  0x38   :  { %78 = vperm.xlu0 %637, %v73_v1   ;;  %v640_v3 = vld [vmem:[#allocation2] sm:$0xff]   ;;  %546 = vmatprep.subr.bf16.mxu0 %v639_v2  ;;  %v644_v8 = vld [vmem:[#allocation2 + $0x10] sm:$0xff]   ;;  %v645_v9 = vld [vmem:[#allocation2 + $0x58] sm:$0xff]   ;;  %v75_v27 = vand.u32 127, %v74_v26  ;;  %vm774_vm3 = vmmov 0   ;;  %s775_s25 = smov [#allocation8]  }
  0x39   :  { %547 = vmatpush3.bf16.msra.mxu0 %v640_v3  ;;  %586 = vmatprep.subr.bf16.mxu1 %v772_v10  ;;  %v646_v11 = vld [vmem:[#allocation2 + $0x18] sm:$0xff]   ;;  %v647_v12 = vld [vmem:[#allocation2 + $0x60] sm:$0xff]   ;;  %v649_v14 = vld [vmem:[#allocation2 + $0x68] sm:$0xff]   ;;  %s498_s26 = sshll.u32 %s775_s25, 4  ;;  %s499_s26 = int_to_ptr.vmem [resolvable:$true] %s498_s26 }
  0x3a   :  { %548 = vmatprep.subr.bf16.mxu0 %v641_v4  ;;  %v648_v13 = vld [vmem:[#allocation2 + $0x20] sm:$0xff]   ;;  %v656_v16 = vld [vmem:[#allocation5 + $0x8] sm:$0xff]   ;;  %v651_v18 = vld [vmem:[#allocation2 + $0x70] sm:$0xff]   ;;  %vm76_vm0 = vcmp.lt.s32.totalorder %v75_v27, 64  ;;  %v84_v29 = vand.u32 63, %v75_v27  ;;  %602 = vmatprep.mubr.msk.bf16.mxu1 %vm774_vm3, %v772_v10  ;;  %p742_p11 = scmp.lt.s32.totalorder %s499_s26, %s499_s26 }
  0x3b   :  { %v655_v15 = vld [vmem:[#allocation5] sm:$0xff]   ;;  %v650_v17 = vld [vmem:[#allocation2 + $0x28] sm:$0xff]   ;;  %v652_v19 = vld [vmem:[#allocation2 + $0x30] sm:$0xff]  }
  0x3c   :  { %638 = vset.pattern.permute.xlu0 %v771_v6  ;;  %587 = vmatpush3.bf16.msra.mxu1 %v655_v15  ;;  %v657_v20 = vld [vmem:[#allocation5 + $0x10] sm:$0xff]   ;;  %v653_v21 = vld [vmem:[#allocation2 + $0x78] sm:$0xff]   ;;  %v659_v24 = vld [vmem:[#allocation5 + $0x20] sm:$0xff]  }
  0x3d   :  { %81 = vperm.xlu0 %638, %v73_v1   ;;  %549 = vmatpush3.bf16.msra.mxu0 %v642_v5  ;;  %v658_v22 = vld [vmem:[#allocation5 + $0x18] sm:$0xff]   ;;  %v660_v25 = vld [vmem:[#allocation5 + $0x28] sm:$0xff]   ;;  %v72_v32 = vld [vmem:[%s918_s0] sm:$0xf] }
  0x3e   :  { %550 = vmatprep.subr.bf16.mxu0 %v643_v7  ;;  %588 = vmatprep.subr.bf16.mxu1 %v772_v10  ;;  %v654_v23 = vld [vmem:[#allocation2 + $0x38] sm:$0xff]   ;;  %v661_v34 = vld [vmem:[#allocation5 + $0x30] sm:$0xff]   ;;  %v663_v36 = vld [vmem:[#allocation7] sm:$0xff]  }
  0x3f   :  { %v662_v35 = vld [vmem:[#allocation5 + $0x38] sm:$0xff]   ;;  %v664_v37 = vld [vmem:[#allocation7 + $0x8] sm:$0xff]   ;;  %v665_v38 = vld [vmem:[#allocation7 + $0x10] sm:$0xff]  }
  0x40   :  { %589 = vmatpush3.bf16.msra.mxu1 %v656_v16  ;;  %v666_v39 = vld [vmem:[#allocation7 + $0x18] sm:$0xff]   ;;  %v667_v40 = vld [vmem:[#allocation7 + $0x20] sm:$0xff]   ;;  %v668_v41 = vld [vmem:[#allocation7 + $0x28] sm:$0xff]  }
  0x41   :  { %551 = vmatpush3.bf16.msra.mxu0 %v644_v8  ;;  %590 = vmatprep.subr.bf16.mxu1 %v772_v10  ;;  %v509_v43 = vld [vmem:[%s921_s3] ss:$0 sm:$0xff]  ;;  %v669_v51 = vld [vmem:[#allocation7 + $0x30] sm:$0xff]   ;;  %v670_v52 = vld [vmem:[#allocation7 + $0x38] sm:$0xff]  }
  0x42   :  { %552 = vmatprep.subr.bf16.mxu0 %v645_v9  ;;  %v528_v53 = vld [vmem:[%s923_s5] ss:$0 sm:$0xff]  ;;  %s737_s5 = scalar_lea.vmem %s499_s26, 64 }
  0x43   :  { %v537_v61 = vld [vmem:[%s925_s7] ss:$0 sm:$0xff]  ;;  %p738_p10 = scmp.ne.s32.totalorder %s499_s26, %s737_s5  ;;  %p743_p12 = scmp.lt.s32.totalorder %s737_s5, %s737_s5 }
  0x44   :  { %591 = vmatpush3.bf16.msra.mxu1 %v657_v20 }
  0x45   :  { %553 = vmatpush3.bf16.msra.mxu0 %v646_v11  ;;  %592 = vmatprep.subr.bf16.mxu1 %v772_v10  ;;  %p744_p13 = por %p743_p12, %p742_p11 }
  0x46   :  { %554 = vmatprep.subr.bf16.mxu0 %v647_v12 }
  0x47   :  { %p745_p0 = pnand %p744_p13, %p738_p10 }
  0x48   :  { %593 = vmatpush3.bf16.msra.mxu1 %v658_v22 }
  0x49   :  { %555 = vmatpush3.bf16.msra.mxu0 %v648_v13  ;;  %594 = vmatprep.subr.bf16.mxu1 %v772_v10 }
  0x4a   :  { %556 = vmatprep.subr.bf16.mxu0 %v649_v14 }
  0x4c   :  { %595 = vmatpush3.bf16.msra.mxu1 %v659_v24 }
  0x4d   :  { %557 = vmatpush3.bf16.msra.mxu0 %v650_v17  ;;  %596 = vmatprep.subr.bf16.mxu1 %v772_v10 }
  0x4e   :  { %558 = vmatprep.subr.bf16.mxu0 %v651_v18 }
  0x50   :  { %597 = vmatpush3.bf16.msra.mxu1 %v660_v25 }
  0x51   :  { %559 = vmatpush3.bf16.msra.mxu0 %v652_v19  ;;  %598 = vmatprep.subr.bf16.mxu1 %v772_v10 }
  0x52   :  { %560 = vmatprep.subr.bf16.mxu0 %v653_v21 }
  0x54   :  { %599 = vmatpush3.bf16.msra.mxu1 %v661_v34 }
  0x55   :  { %561 = vmatpush3.bf16.msra.mxu0 %v654_v23  ;;  %600 = vmatprep.subr.bf16.mxu1 %v772_v10 }
  0x56   :  { %606 = vmatprep.subr.bf16.mxu0 %v772_v10 }
  0x58   :  { %601 = vmatpush3.bf16.msra.mxu1 %v662_v35 }
  0xb7   :  { %v79_v28 = vpop.permute.xlu0 %78 }
  0xbc   :  { %v82_v30 = vpop.permute.xlu0 %81 }
  0xbd   :  { %v83_v31 = vsel %vm76_vm0, %v79_v28, %v82_v30 }
  0xbe   :  { %vm85_vm1 = vcmp.eq.s32.totalorder %v84_v29, %v83_v31 }
  0xbf   :  { %vm526_vm2 = vmpackc.low %vm85_vm1, %vm85_vm1 }
  0xc0   :  { %527 = vmatprep.mubr.msk.bf16.mxu0 %vm526_vm2, %v773_v33 }
  0xc1   :  { %257 = vmatmul.mubr.bf16.vlgmr.msra.gmra.mrb[0].mxu0 %v72_v32 }
  0xc2   :  { %622 = vmatprep.mubr.msk.bf16.mxu0 %vm774_vm3, %v772_v10  ;;  %607 = vmatpush3.bf16.msra.mxu0 %v663_v36 }
  0xc3   :  { %608 = vmatprep.subr.bf16.mxu0 %v772_v10 }
  0xc6   :  { %609 = vmatpush3.bf16.msra.mxu0 %v664_v37 }
  0xc7   :  { %610 = vmatprep.subr.bf16.mxu0 %v772_v10 }
  0xca   :  { %611 = vmatpush3.bf16.msra.mxu0 %v665_v38 }
  0xcb   :  { %612 = vmatprep.subr.bf16.mxu0 %v772_v10 }
  0xce   :  { %613 = vmatpush3.bf16.msra.mxu0 %v666_v39 }
  0xcf   :  { %614 = vmatprep.subr.bf16.mxu0 %v772_v10 }
  0xd2   :  { %615 = vmatpush3.bf16.msra.mxu0 %v667_v40 }
  0xd3   :  { %616 = vmatprep.subr.bf16.mxu0 %v772_v10 }
  0xd6   :  { %617 = vmatpush3.bf16.msra.mxu0 %v668_v41 }
  0xd7   :  { %618 = vmatprep.subr.bf16.mxu0 %v772_v10 }
  0xda   :  { %619 = vmatpush3.bf16.msra.mxu0 %v669_v51 }
  0xdb   :  { %620 = vmatprep.subr.bf16.mxu0 %v772_v10 }
  0xde   :  { %621 = vmatpush3.bf16.msra.mxu0 %v670_v52 }
 0x194   :  { %v562_v42 = vpop.f32.mrb[0].mxu0 }
 0x195   :  { %v563_v44 = vpop.f32.mrb[1].mxu0 }
 0x196   :  { %v564_v45 = vadd.f32 %v563_v44, %v562_v42  ;;  %v565_v46 = vpop.f32.mrb[2].mxu0 }
 0x197   :  { %v566_v47 = vpop.f32.mrb[3].mxu0 }
 0x198   :  { %v259_v48 = vadd.f32 %v564_v45, %v509_v43 }
 0x19a   :  { %v264_v49 = vmax.f32 %v259_v48, 0.0 }
 0x19c   :  { %v265_v50 = vpack.c.bf16 %v264_v49, %v264_v49 }
 0x19e   :  { %603 = vmatmul.mubr.bf16.vlgmr.msra.gmra.mrb[0].mxu1 %v265_v50 }
 0x271   :  { %v371_v54 = vpop.f32.mrb[0].mxu1 }
 0x272   :  { %v372_v55 = vadd.f32 %v528_v53, %v371_v54  ;;  %v604_v56 = vpop.f32.mrb[1].mxu1 }
 0x273   :  { %v374_v57 = vpop.f32.mrb[2].mxu1 }
 0x274   :  { %v377_v58 = vmax.f32 %v372_v55, 0.0  ;;  %v605_v59 = vpop.f32.mrb[3].mxu1 }
 0x276   :  { %v378_v60 = vpack.c.bf16 %v377_v58, %v377_v58 }
 0x278   :  { %623 = vmatmul.mubr.bf16.vlgmr.msra.gmra.mrb[4].mxu0 %v378_v60 }
 0x34b   :  { %v484_v62 = vpop.f32.mrb[4].mxu0 }
 0x34c   :  { %v485_v63 = vadd.f32 %v537_v61, %v484_v62  ;;  %v624_v0 = vpop.f32.mrb[5].mxu0 }
 0x34d   :  { %v487_v1 = vpop.f32.mrb[6].mxu0 }
 0x34e   :  { %v490_v2 = vpack.c.bf16 %v485_v63, %v485_v63  ;;  %v625_v3 = vpop.f32.mrb[7].mxu0 }
 0x350   :  { %491 = vst [vmem:[#allocation8] sm:$0xf] %v490_v2 }
 0x351   :  { %748 = shalt.err (!%p745_p0)
}
 0x352   :  { %s749_s7 = scalar_lea.hbm %s926_s8, 64 }
 0x353   :  { %p750_p1 = scmp.ne.s32.totalorder %s926_s8, %s749_s7  ;;  %p753_p2 = scmp.lt.u32.totalorder %s749_s7, %s926_s8 }
 0x355   :  { %p755_p3 = pnand %p753_p2, %p750_p1 }
 0x357   :  { %758 = shalt.err (!%p755_p3)
}
 0x358   :  { %501 = dma.vmem_to_hbm [thread:$0]  %s499_s26, 64, %s926_s8, [#allocation4]  }
 0x359   :  { %763 = dma.done.wait [#allocation4], 64  }
 0x35a   :  { %764 = vsyncadd [#allocation4], 4294967232 }
 0x35b   :  { %505 = vsyncpa [#allocation3], 1 }
 0x35c   :  { %506 = vsyncpa [#allocation6], 1 }
 0x35d   :  { %507 = vsyncpa [#allocation4], 1 }

</bundles_post_ra>
